<compile_context>
chip_gen: v5e
topology: v5e:2x2
jax: 0.10.0
libtpu: 0.0.40
codegen_flags: <defaults>
</compile_context>

<pallas_src>
import functools

import jax
import jax.numpy as jnp
from jax.experimental import pallas as pl
from jax.experimental.pallas import tpu as pltpu


K_IN = 28 * 28          # input features (nn.Flatten of (1, 28, 28))
N1, N2, N3 = 128, 64, 10


def _round_up(n, m):
    return ((n + m - 1) // m) * m


def fcnet_kernel(x_ref, w1_ref, b1_ref, w2_ref, b2_ref, w3_ref, b3_ref, o_ref):
    # x tile arrives as f32 straight from the caller's input; cast to bf16 for
    # the MXU inside the kernel (hidden under the x DMA on this HBM-bound kernel).
    x = x_ref[...].astype(jnp.bfloat16)                               # (TB, 784)
    # fc1 + ReLU: bf16 MXU matmul, f32 accumulate, bias/ReLU in f32.
    h1 = jnp.dot(x, w1_ref[...], preferred_element_type=jnp.float32)
    h1 = jnp.maximum(h1 + b1_ref[...], 0.0).astype(jnp.bfloat16)      # (TB, 128)
    # fc2 + ReLU
    h2 = jnp.dot(h1, w2_ref[...], preferred_element_type=jnp.float32)
    h2 = jnp.maximum(h2 + b2_ref[...], 0.0).astype(jnp.bfloat16)      # (TB, 64)
    # fc3 (logits): unpadded (TB, 10) f32 store (masked vst, negligible bytes).
    o_ref[...] = (jnp.dot(h2, w3_ref[...], preferred_element_type=jnp.float32)
                  + b3_ref[...]).astype(o_ref.dtype)


def prepare_params(params_f32):
    """One-time kernel-side parameter prep (call once, reuse every forward):
    cast weights to bf16 (MXU-native), keep biases f32 with (1, N) layout."""
    w1, b1, w2, b2, w3, b3 = params_f32
    return (w1.astype(jnp.bfloat16), jnp.asarray(b1, jnp.float32).reshape(1, N1),
            w2.astype(jnp.bfloat16), jnp.asarray(b2, jnp.float32).reshape(1, N2),
            w3.astype(jnp.bfloat16), jnp.asarray(b3, jnp.float32).reshape(1, N3))


def fcnet_forward(x, kparams, *, tb=1024):
    """x: (B, 1, 28, 28) float32 (NCHW).  kparams: output of prepare_params().
    Returns (B, 10) float32 logits."""
    w1, b1, w2, b2, w3, b3 = kparams
    B = x.shape[0]
    x_flat = x.reshape(B, K_IN)          # nn.Flatten(); layout-only, no copy

    tb = max(8, _round_up(tb, 8))
    if B > tb:
        TB = tb                              # multiple of 8; last tile may be partial
    elif B >= 16:
        # Split into two tiles so the "parallel" batch axis can span both
        # TensorCores on megacore parts (v7x); last tile may be partial.
        TB = _round_up((B + 1) // 2, 8)
    else:
        TB = B                               # single block == full array dims
    grid = (pl.cdiv(B, TB),)

    def const_spec(shape):
        # Constant block index: fetched once, stays resident in VMEM across tiles.
        return pl.BlockSpec(shape, lambda i: (0, 0))

    weight_bytes = (w1.size + w2.size + w3.size) * 2 + (b1.size + b2.size + b3.size) * 4
    cost = pl.CostEstimate(
        flops=2 * B * (K_IN * N1 + N1 * N2 + N2 * N3),
        transcendentals=0,
        bytes_accessed=B * K_IN * 4 + weight_bytes + B * N3 * 4,
    )

    return pl.pallas_call(
        fcnet_kernel,
        out_shape=jax.ShapeDtypeStruct((B, N3), jnp.float32),
        grid=grid,
        in_specs=[
            pl.BlockSpec((TB, K_IN), lambda i: (i, 0)),   # x: streamed per batch tile (f32)
            const_spec((K_IN, N1)),                       # w1 (bf16)
            const_spec((1, N1)),                          # b1 (f32)
            const_spec((N1, N2)),                         # w2 (bf16)
            const_spec((1, N2)),                          # b2 (f32)
            const_spec((N2, N3)),                         # w3 (bf16, unpadded)
            const_spec((1, N3)),                          # b3 (f32, unpadded)
        ],
        out_specs=pl.BlockSpec((TB, N3), lambda i: (i, 0)),
        compiler_params=pltpu.CompilerParams(
            dimension_semantics=("parallel",),
        ),
        cost_estimate=cost,
    )(x_flat, w1, b1, w2, b2, w3, b3)


def init_params(key):
    """Deterministic init matching PyTorch nn.Linear shapes (weights stored (in, out))."""
    def linear(key, fan_in, fan_out):
        kw, kb = jax.random.split(key)
        bound = 1.0 / (fan_in ** 0.5)
        w = jax.random.uniform(kw, (fan_in, fan_out), jnp.float32, -bound, bound)
        b = jax.random.uniform(kb, (1, fan_out), jnp.float32, -bound, bound)
        return w, b

    k1, k2, k3 = jax.random.split(key, 3)
    w1, b1 = linear(k1, K_IN, N1)
    w2, b2 = linear(k2, N1, N2)
    w3, b3 = linear(k3, N2, N3)
    return (w1, b1, w2, b2, w3, b3)


def fcnet_reference_f32(x, params):
    """Full-f32 reference (PyTorch semantics)."""
    w1, b1, w2, b2, w3, b3 = params
    xf = x.reshape(x.shape[0], -1)
    h1 = jnp.maximum(xf @ w1 + b1, 0.0)
    h2 = jnp.maximum(h1 @ w2 + b2, 0.0)
    return h2 @ w3 + b3


def fcnet_reference_bf16(x, params):
    """Reference mirroring the kernel's bf16-matmul / f32-accumulate math."""
    w1, b1, w2, b2, w3, b3 = params
    xf = x.reshape(x.shape[0], -1).astype(jnp.bfloat16)
    h1 = jnp.dot(xf, w1.astype(jnp.bfloat16), preferred_element_type=jnp.float32)
    h1 = jnp.maximum(h1 + b1, 0.0).astype(jnp.bfloat16)
    h2 = jnp.dot(h1, w2.astype(jnp.bfloat16), preferred_element_type=jnp.float32)
    h2 = jnp.maximum(h2 + b2, 0.0).astype(jnp.bfloat16)
    return jnp.dot(h2, w3.astype(jnp.bfloat16), preferred_element_type=jnp.float32) + b3


def _check(x, params_f32, kparams, **kw):
    fwd = jax.jit(functools.partial(fcnet_forward, **kw))
    out = jax.block_until_ready(fwd(x, kparams))
    assert out.shape == (x.shape[0], N3), out.shape
    # Tight check vs. a reference with identical bf16/f32 math.
    ref_bf16 = fcnet_reference_bf16(x, params_f32)
    assert jnp.allclose(out, ref_bf16, atol=5e-3, rtol=5e-3), "mismatch vs bf16 reference"
    # Loose check vs. full-f32 PyTorch-semantics reference (bf16 quantization).
    ref_f32 = fcnet_reference_f32(x, params_f32)
    assert jnp.allclose(out, ref_f32, atol=5e-2, rtol=5e-2), "mismatch vs f32 reference"


if __name__ == "__main__":
    key = jax.random.PRNGKey(0)
    kx, kx2, kx3, kp = jax.random.split(key, 4)
    params = init_params(kp)
    kparams = prepare_params(params)   # one-time weight prep (bf16 cast)

    # Small batch: single full-array block (grid=(1,)), no padding anywhere.
    x_small = jax.random.normal(kx, (2, 1, 28, 28), dtype=jnp.float32)  # NCHW, like MNIST
    _check(x_small, params, kparams)

    # Exact-multiple multi-tile path: grid=(4,), resident weights across tiles.
    x_mid = jax.random.normal(kx3, (512, 1, 28, 28), dtype=jnp.float32)
    _check(x_mid, params, kparams, tb=128)

    # Non-multiple batch: exercises the partial last tile (grid=(3,): 256+256+88).
    x_big = jax.random.normal(kx2, (600, 1, 28, 28), dtype=jnp.float32)
    _check(x_big, params, kparams, tb=256)

    print("KERNEL_OK")
</pallas_src>

<mosaic_0001>
module attributes {stable_mosaic.version = 11 : i64} {
  func.func @fcnet_kernel(%arg0: i32, %arg1: memref<2x784xf32, #tpu.memory_space<vmem>>, %arg2: memref<784x128xbf16, #tpu.memory_space<vmem>>, %arg3: memref<1x128xf32, #tpu.memory_space<vmem>>, %arg4: memref<128x64xbf16, #tpu.memory_space<vmem>>, %arg5: memref<1x64xf32, #tpu.memory_space<vmem>>, %arg6: memref<64x10xbf16, #tpu.memory_space<vmem>>, %arg7: memref<1x10xf32, #tpu.memory_space<vmem>>, %arg8: memref<2x10xf32, #tpu.memory_space<vmem>>) attributes {dimension_semantics = [#tpu.dimension_semantics<parallel>], iteration_bounds = array<i64: 1>, scalar_prefetch = 0 : i64, scratch_operands = 0 : i64, tpu.core_type = #tpu.core_type<tc>, window_params = [{transform_indices = @transform_0, window_bounds = array<i64: 2, 784>}, {pipeline_mode = #tpu.pipeline_mode<synchronous>, transform_indices = @transform_1, window_bounds = array<i64: 784, 128>}, {pipeline_mode = #tpu.pipeline_mode<synchronous>, transform_indices = @transform_2, window_bounds = array<i64: 1, 128>}, {pipeline_mode = #tpu.pipeline_mode<synchronous>, transform_indices = @transform_3, window_bounds = array<i64: 128, 64>}, {pipeline_mode = #tpu.pipeline_mode<synchronous>, transform_indices = @transform_4, window_bounds = array<i64: 1, 64>}, {pipeline_mode = #tpu.pipeline_mode<synchronous>, transform_indices = @transform_5, window_bounds = array<i64: 64, 10>}, {pipeline_mode = #tpu.pipeline_mode<synchronous>, transform_indices = @transform_6, window_bounds = array<i64: 1, 10>}, {transform_indices = @transform_7, window_bounds = array<i64: 2, 10>}]} {
    %c0 = arith.constant 0 : index
    %c0_0 = arith.constant 0 : index
    %0 = vector.load %arg1[%c0, %c0_0] : memref<2x784xf32, #tpu.memory_space<vmem>>, vector<2x784xf32>
    %1 = arith.truncf %0 : vector<2x784xf32> to vector<2x784xbf16>
    %c0_1 = arith.constant 0 : index
    %c0_2 = arith.constant 0 : index
    %2 = vector.load %arg2[%c0_1, %c0_2] : memref<784x128xbf16, #tpu.memory_space<vmem>>, vector<784x128xbf16>
    %cst = arith.constant dense<0.000000e+00> : vector<2x128xf32>
    %3 = tpu.matmul %1, %2, %cst {dimension_numbers = #tpu.dot_dimension_numbers<[1], [0], [0], [1], [0, 0, 1, 1], [], []>} : vector<2x784xbf16>, vector<784x128xbf16>, vector<2x128xf32> -> vector<2x128xf32>
    %c0_3 = arith.constant 0 : index
    %c0_4 = arith.constant 0 : index
    %4 = vector.load %arg3[%c0_3, %c0_4] : memref<1x128xf32, #tpu.memory_space<vmem>>, vector<1x128xf32>
    %5 = vector.broadcast %4 : vector<1x128xf32> to vector<2x128xf32>
    %6 = arith.addf %3, %5 : vector<2x128xf32>
    %cst_5 = arith.constant 0.000000e+00 : f32
    %7 = vector.broadcast %cst_5 : f32 to vector<2x128xf32>
    %8 = arith.maximumf %6, %7 : vector<2x128xf32>
    %9 = arith.truncf %8 : vector<2x128xf32> to vector<2x128xbf16>
    %c0_6 = arith.constant 0 : index
    %c0_7 = arith.constant 0 : index
    %10 = vector.load %arg4[%c0_6, %c0_7] : memref<128x64xbf16, #tpu.memory_space<vmem>>, vector<128x64xbf16>
    %cst_8 = arith.constant dense<0.000000e+00> : vector<2x64xf32>
    %11 = tpu.matmul %9, %10, %cst_8 {dimension_numbers = #tpu.dot_dimension_numbers<[1], [0], [0], [1], [0, 0, 1, 1], [], []>} : vector<2x128xbf16>, vector<128x64xbf16>, vector<2x64xf32> -> vector<2x64xf32>
    %c0_9 = arith.constant 0 : index
    %c0_10 = arith.constant 0 : index
    %12 = vector.load %arg5[%c0_9, %c0_10] : memref<1x64xf32, #tpu.memory_space<vmem>>, vector<1x64xf32>
    %13 = vector.broadcast %12 : vector<1x64xf32> to vector<2x64xf32>
    %14 = arith.addf %11, %13 : vector<2x64xf32>
    %cst_11 = arith.constant 0.000000e+00 : f32
    %15 = vector.broadcast %cst_11 : f32 to vector<2x64xf32>
    %16 = arith.maximumf %14, %15 : vector<2x64xf32>
    %17 = arith.truncf %16 : vector<2x64xf32> to vector<2x64xbf16>
    %c0_12 = arith.constant 0 : index
    %c0_13 = arith.constant 0 : index
    %18 = vector.load %arg6[%c0_12, %c0_13] : memref<64x10xbf16, #tpu.memory_space<vmem>>, vector<64x10xbf16>
    %cst_14 = arith.constant dense<0.000000e+00> : vector<2x10xf32>
    %19 = tpu.matmul %17, %18, %cst_14 {dimension_numbers = #tpu.dot_dimension_numbers<[1], [0], [0], [1], [0, 0, 1, 1], [], []>} : vector<2x64xbf16>, vector<64x10xbf16>, vector<2x10xf32> -> vector<2x10xf32>
    %c0_15 = arith.constant 0 : index
    %c0_16 = arith.constant 0 : index
    %20 = vector.load %arg7[%c0_15, %c0_16] : memref<1x10xf32, #tpu.memory_space<vmem>>, vector<1x10xf32>
    %21 = vector.broadcast %20 : vector<1x10xf32> to vector<2x10xf32>
    %22 = arith.addf %19, %21 : vector<2x10xf32>
    %c0_17 = arith.constant 0 : index
    %c0_18 = arith.constant 0 : index
    %23 = vector.load %arg8[%c0_17, %c0_18] : memref<2x10xf32, #tpu.memory_space<vmem>>, vector<2x10xf32>
    tpu.vector_store %arg8[%c0_17, %c0_18], %22 {strides = array<i32>} : memref<2x10xf32, #tpu.memory_space<vmem>>, vector<2x10xf32>,
    return
  }
  func.func @transform_0(%arg0: i32) -> (i32, i32) {
    %c0_i32 = arith.constant 0 : i32
    %c0_i32_0 = arith.constant 0 : i32
    return %arg0, %c0_i32 : i32, i32
  }
  func.func @transform_1(%arg0: i32) -> (i32, i32) {
    %c0_i32 = arith.constant 0 : i32
    %c0_i32_0 = arith.constant 0 : i32
    %c0_i32_1 = arith.constant 0 : i32
    return %c0_i32, %c0_i32_0 : i32, i32
  }
  func.func @transform_2(%arg0: i32) -> (i32, i32) {
    %c0_i32 = arith.constant 0 : i32
    %c0_i32_0 = arith.constant 0 : i32
    %c0_i32_1 = arith.constant 0 : i32
    return %c0_i32, %c0_i32_0 : i32, i32
  }
  func.func @transform_3(%arg0: i32) -> (i32, i32) {
    %c0_i32 = arith.constant 0 : i32
    %c0_i32_0 = arith.constant 0 : i32
    %c0_i32_1 = arith.constant 0 : i32
    return %c0_i32, %c0_i32_0 : i32, i32
  }
  func.func @transform_4(%arg0: i32) -> (i32, i32) {
    %c0_i32 = arith.constant 0 : i32
    %c0_i32_0 = arith.constant 0 : i32
    %c0_i32_1 = arith.constant 0 : i32
    return %c0_i32, %c0_i32_0 : i32, i32
  }
  func.func @transform_5(%arg0: i32) -> (i32, i32) {
    %c0_i32 = arith.constant 0 : i32
    %c0_i32_0 = arith.constant 0 : i32
    %c0_i32_1 = arith.constant 0 : i32
    return %c0_i32, %c0_i32_0 : i32, i32
  }
  func.func @transform_6(%arg0: i32) -> (i32, i32) {
    %c0_i32 = arith.constant 0 : i32
    %c0_i32_0 = arith.constant 0 : i32
    %c0_i32_1 = arith.constant 0 : i32
    return %c0_i32, %c0_i32_0 : i32, i32
  }
  func.func @transform_7(%arg0: i32) -> (i32, i32) {
    %c0_i32 = arith.constant 0 : i32
    %c0_i32_0 = arith.constant 0 : i32
    return %arg0, %c0_i32 : i32, i32
  }
}

</mosaic_0001>

<bundles_post_ra>
// kernel: fcnet_forward.1
= control target key start
LH: loop header
LB: loop body
LE: loop exit
PB: predicated region body
PF: predicated region fallthrough
CT: control target
= control target key end

     0   :  { %12 = vsyncpa [#allocation3], 0  ;;  %s1187_s0 = inlined_call_operand.vmem [shape: f32[2,784], index: 0, kind: input, shape index: {}]   ;;  %s1188_s1 = inlined_call_operand.hbm [shape: bf16[784,128], index: 1, kind: input, shape index: {}]   ;;  %s1189_s2 = inlined_call_operand.vmem [shape: f32[1,128], index: 2, kind: input, shape index: {}]   ;;  %s1190_s3 = inlined_call_operand.vmem [shape: bf16[128,64], index: 3, kind: input, shape index: {}]   ;;  %s1191_s4 = inlined_call_operand.vmem [shape: f32[1,64], index: 4, kind: input, shape index: {}]   ;;  %s1192_s5 = inlined_call_operand.vmem [shape: bf16[64,10], index: 5, kind: input, shape index: {}]   ;;  %s1193_s6 = inlined_call_operand.vmem [shape: f32[1,10], index: 6, kind: input, shape index: {}]   ;;  %s1194_s7 = inlined_call_operand.hbm [shape: f32[2,10], index: 7, kind: output, shape index: {}]  }
   0x1   :  { %13 = vsyncpa [#allocation4], 0  ;;  %s20_s26 = sshll.u32 %s1188_s1, 4  ;;  %s1086_s27 = smov [#allocation2]   ;;  %s21_s26 = int_to_ptr.hbm [resolvable:$true] %s20_s26 }
   0x2   :  { %s22_s28 = sshll.u32 %s1086_s27, 4  ;;  %s1087_s29 = smov 64   ;;  %s23_s28 = int_to_ptr.vmem [resolvable:$true] %s22_s28 }
   0x3   :  { %s1088_s30 = smov 4  }
   0x4   :  { %28 = dma.hbm_to_vmem [thread:$0]  %s21_s26, 6272, %s23_s28, [#allocation3], %s1087_s29, %s1087_s29, %s1088_s30  }
   0x5   :  { %1082 = dma.done.wait [#allocation3], 6272  }
   0x6   :  { %1083 = vsyncadd [#allocation3], 4294961024  ;;  %v973_v0 = vld [vmem:[#allocation2 + $0x38] sm:$0xff]  ;;  %v972_v3 = vld [vmem:[#allocation2 + $0x30] sm:$0xff]  ;;  %vm468_vm0 = vcmask 130048   ;;  %vm684_vm1 = vcmask 523264  }
   0x7   :  { %v981_v1 = vld [vmem:[#allocation2 + $0x78] sm:$0xff]  ;;  %472 = vmatpush.bf16.msra.mxu0 %v973_v0  ;;  %v980_v4 = vld [vmem:[#allocation2 + $0x70] sm:$0xff]  ;;  %v971_v8 = vld [vmem:[#allocation2 + $0x28] sm:$0xff]  ;;  %s1089_s13 = smov [#allocation5]   ;;  %s710_s16 = sshll.u32 %s1194_s7, 4  ;;  %vm701_vm2 = vcmask 74752   ;;  %s711_s16 = int_to_ptr.hbm [resolvable:$true] %s710_s16 }
   0x8   :  { %v989_v2 = vld [vmem:[#allocation2 + $0xb8] sm:$0xff]  ;;  %485 = vmatpush.bf16.msra.mxu1 %v981_v1  ;;  %v988_v5 = vld [vmem:[#allocation2 + $0xb0] sm:$0xff]  ;;  %v979_v9 = vld [vmem:[#allocation2 + $0x68] sm:$0xff]  ;;  %s708_s14 = sshll.u32 %s1089_s13, 4  ;;  %s709_s14 = int_to_ptr.vmem [resolvable:$true] %s708_s14 }
   0x9   :  { %498 = vmatpush.bf16.msra.mxu2 %v989_v2  ;;  %v997_v6 = vld [vmem:[#allocation2 + $0xf8] sm:$0xff]  ;;  %v996_v7 = vld [vmem:[#allocation2 + $0xf0] sm:$0xff]  ;;  %v987_v10 = vld [vmem:[#allocation2 + $0xa8] sm:$0xff] }
   0xa   :  { %511 = vmatpush.bf16.msra.mxu3 %v997_v6  ;;  %v995_v11 = vld [vmem:[#allocation2 + $0xe8] sm:$0xff]  ;;  %v970_v12 = vld [vmem:[#allocation2 + $0x20] sm:$0xff]  ;;  %v44_v15 = vld [vmem:[%s1187_s0] sm:$0xff] }
   0xb   :  { %473 = vmatpush.bf16.msra.mxu0 %v972_v3  ;;  %v978_v13 = vld [vmem:[#allocation2 + $0x60] sm:$0xff]  ;;  %48 = vst [vmem:[#allocation1] ss:$4 sm:$0xff] %v44_v15  ;;  %v969_v17 = vld [vmem:[#allocation2 + $0x18] sm:$0xff]  ;;  %v968_v22 = vld [vmem:[#allocation2 + $0x10] sm:$0xff] }
   0xc   :  { %486 = vmatpush.bf16.msra.mxu1 %v980_v4  ;;  %v986_v14 = vld [vmem:[#allocation2 + $0xa0] sm:$0xff]  ;;  %v977_v18 = vld [vmem:[#allocation2 + $0x58] sm:$0xff]  ;;  %v976_v23 = vld [vmem:[#allocation2 + $0x50] sm:$0xff] }
   0xd   :  { %499 = vmatpush.bf16.msra.mxu2 %v988_v5  ;;  %v994_v16 = vld [vmem:[#allocation2 + $0xe0] sm:$0xff]  ;;  %v985_v20 = vld [vmem:[#allocation2 + $0x98] sm:$0xff]  ;;  %v984_v24 = vld [vmem:[#allocation2 + $0x90] sm:$0xff] }
   0xe   :  { %512 = vmatpush.bf16.msra.mxu3 %v996_v7  ;;  %v45_v19 = vld [vmem:[%s1187_s0 + $0x8] sm:$0x3f]  ;;  %v993_v21 = vld [vmem:[#allocation2 + $0xd8] sm:$0xff]  ;;  %v992_v25 = vld [vmem:[#allocation2 + $0xd0] sm:$0xff] }
   0xf   :  { %474 = vmatpush.bf16.msra.mxu0 %v971_v8  ;;  %50 = vst [vmem:[#allocation1 + $0x20] ss:$4 sm:$0xff] %v45_v19  ;;  %v967_v26 = vld [vmem:[#allocation2 + $0x8] sm:$0xff]  ;;  %v966_v29 = vld [vmem:[#allocation2] sm:$0xff]  ;;  %v1005_v34 = vld [vmem:[#allocation2 + $0x138] sm:$0xff] }
  0x10   :  { %487 = vmatpush.bf16.msra.mxu1 %v979_v9  ;;  %v975_v27 = vld [vmem:[#allocation2 + $0x48] sm:$0xff]  ;;  %v974_v30 = vld [vmem:[#allocation2 + $0x40] sm:$0xff]  ;;  %v1013_v35 = vld [vmem:[#allocation2 + $0x178] sm:$0xff] }
  0x11   :  { %500 = vmatpush.bf16.msra.mxu2 %v987_v10  ;;  %v983_v28 = vld [vmem:[#allocation2 + $0x88] sm:$0xff]  ;;  %v982_v36 = vld [vmem:[#allocation2 + $0x80] sm:$0xff]  ;;  %v1004_v43 = vld [vmem:[#allocation2 + $0x130] sm:$0xff] }
  0x12   :  { %513 = vmatpush.bf16.msra.mxu3 %v995_v11  ;;  %v991_v31 = vld [vmem:[#allocation2 + $0xc8] sm:$0xff]  ;;  %v51_v32 = vld.sshfl [vmem:[#allocation1] sm:$0xff pattern:$0x73625140]  ;;  %v990_v40 = vld [vmem:[#allocation2 + $0xc0] sm:$0xff] }
  0x13   :  { %475 = vmatpush.bf16.msra.mxu0 %v970_v12  ;;  %v52_v33 = vld.sshfl [vmem:[#allocation1 + $0x8] sm:$0xff pattern:$0x73625140]  ;;  %v53_v37 = vld.sshfl [vmem:[#allocation1 + $0x10] sm:$0xff pattern:$0x73625140]  ;;  %v65_v38 = vpack.c.bf16 %v51_v32, %v51_v32 }
  0x14   :  { %488 = vmatpush.bf16.msra.mxu1 %v978_v13  ;;  %v66_v39 = vpack.c.bf16 %v52_v33, %v52_v33  ;;  %v1014_v41 = vld [vmem:[#allocation2 + $0x180] sm:$0xff]  ;;  %v54_v42 = vld.sshfl [vmem:[#allocation1 + $0x18] sm:$0xff pattern:$0x73625140]  ;;  %v67_v45 = vpack.c.bf16 %v53_v37, %v53_v37  ;;  %v1003_v47 = vld [vmem:[#allocation2 + $0x128] sm:$0xff] }
  0x15   :  { %501 = vmatpush.bf16.msra.mxu2 %v986_v14  ;;  %v1012_v44 = vld [vmem:[#allocation2 + $0x170] sm:$0xff]  ;;  %v68_v46 = vpack.c.bf16 %v54_v42, %v54_v42  ;;  %v1011_v48 = vld [vmem:[#allocation2 + $0x168] sm:$0xff]  ;;  %v1002_v49 = vld [vmem:[#allocation2 + $0x120] sm:$0xff] }
  0x16   :  { %514 = vmatpush.bf16.msra.mxu3 %v994_v16  ;;  %v1010_v50 = vld [vmem:[#allocation2 + $0x160] sm:$0xff]  ;;  %v1001_v51 = vld [vmem:[#allocation2 + $0x118] sm:$0xff]  ;;  %v57_v53 = vld.sshfl [vmem:[#allocation1 + $0x30] sm:$0xff pattern:$0x73625140] }
  0x17   :  { %476 = vmatpush.bf16.msra.mxu0 %v969_v17  ;;  %v1009_v52 = vld [vmem:[#allocation2 + $0x158] sm:$0xff]  ;;  %v1000_v54 = vld [vmem:[#allocation2 + $0x110] sm:$0xff]  ;;  %v71_v56 = vpack.c.bf16 %v57_v53, %v57_v53  ;;  %v999_v57 = vld [vmem:[#allocation2 + $0x108] sm:$0xff] }
  0x18   :  { %489 = vmatpush.bf16.msra.mxu1 %v977_v18  ;;  %v1008_v55 = vld [vmem:[#allocation2 + $0x150] sm:$0xff]  ;;  %v1007_v58 = vld [vmem:[#allocation2 + $0x148] sm:$0xff]  ;;  %v998_v59 = vld [vmem:[#allocation2 + $0x100] sm:$0xff] }
  0x19   :  { %502 = vmatpush.bf16.msra.mxu2 %v985_v20  ;;  %v1006_v60 = vld [vmem:[#allocation2 + $0x140] sm:$0xff]  ;;  %v55_v61 = vld.sshfl [vmem:[#allocation1 + $0x20] sm:$0xff pattern:$0x73625140]  ;;  %v1022_v1 = vld [vmem:[%s1190_s3 + $0x38] sm:$0xff] }
  0x1a   :  { %515 = vmatpush.bf16.msra.mxu3 %v993_v21  ;;  %v56_v62 = vld.sshfl [vmem:[#allocation1 + $0x28] sm:$0xff pattern:$0x73625140]  ;;  %v69_v63 = vpack.c.bf16 %v55_v61, %v55_v61  ;;  %v1021_v2 = vld [vmem:[%s1190_s3 + $0x30] sm:$0xff]  ;;  %v1019_v4 = vld [vmem:[%s1190_s3 + $0x20] sm:$0xff] }
  0x1b   :  { %477 = vmatpush.bf16.msra.mxu0 %v968_v22  ;;  %v70_v0 = vpack.c.bf16 %v56_v62, %v56_v62  ;;  %v1020_v3 = vld [vmem:[%s1190_s3 + $0x28] sm:$0xff]  ;;  %v1018_v5 = vld [vmem:[%s1190_s3 + $0x18] sm:$0xff]  ;;  %v1017_v6 = vld [vmem:[%s1190_s3 + $0x10] sm:$0xff] }
  0x1c   :  { %490 = vmatpush.bf16.msra.mxu1 %v976_v23  ;;  %v1016_v7 = vld [vmem:[%s1190_s3 + $0x8] sm:$0xff]  ;;  %v1015_v10 = vld [vmem:[%s1190_s3] sm:$0xff]  ;;  %v1026_v13 = vld [vmem:[%s1192_s5 + $0x18] sm:$0xff] }
  0x1d   :  { %503 = vmatpush.bf16.msra.mxu2 %v984_v24  ;;  %v1025_v16 = vld [vmem:[%s1192_s5 + $0x10] sm:$0xff]  ;;  %v1031_v17 = vld [vmem:[%s1189_s2] ss:$0 sm:$0xff]  ;;  %v1024_v18 = vld [vmem:[%s1192_s5 + $0x8] sm:$0xff] }
  0x1e   :  { %516 = vmatpush.bf16.msra.mxu3 %v992_v25  ;;  %v1032_v37 = vld [vmem:[%s1191_s4] ss:$0 sm:$0xff] }
  0x1f   :  { %478 = vmatpush.bf16.msra.mxu0 %v967_v26 }
  0x20   :  { %491 = vmatpush.bf16.msra.mxu1 %v975_v27 }
  0x21   :  { %504 = vmatpush.bf16.msra.mxu2 %v983_v28 }
  0x22   :  { %517 = vmatpush.bf16.msra.mxu3 %v991_v31 }
  0x23   :  { %479 = vmatpush.bf16.msra.mxu0 %v966_v29 }
  0x24   :  { %492 = vmatpush.bf16.msra.mxu1 %v974_v30 }
  0x25   :  { %505 = vmatpush.bf16.msra.mxu2 %v982_v36  ;;  %v1023_v36 = vld [vmem:[%s1192_s5] sm:$0xff] }
  0x26   :  { %480 = vmatmul.bf16.vlgmr.msra.gmra.mxu0 %v65_v38  ;;  %518 = vmatpush.bf16.msra.mxu3 %v990_v40 }
  0x27   :  { %524 = vmatpush.bf16.msrb.mxu0 %v1005_v34  ;;  %493 = vmatmul.bf16.vlgmr.msra.gmra.mxu1 %v66_v39 }
  0x28   :  { %537 = vmatpush.bf16.msrb.mxu1 %v1013_v35  ;;  %506 = vmatmul.bf16.vlgmr.msra.gmra.mxu2 %v67_v45 }
  0x29   :  { %557 = vmatpush.bf16.msrb.mxu2 %v1014_v41  ;;  %519 = vmatmul.bf16.vlgmr.msra.gmra.mxu3 %v68_v46 }
  0x2a   :  { %633 = vmatpush.bf16.msrb.mxu3 %v1022_v1 }
  0x2b   :  { %525 = vmatpush.bf16.msrb.mxu0 %v1004_v43  ;;  %v1033_v43 = vld [vmem:[%s1193_s6] ss:$0 sm:$0xff] }
  0x2c   :  { %538 = vmatpush.bf16.msrb.mxu1 %v1012_v44 }
  0x2d   :  { %692 = vmatpush.bf16.msra.mxu2 %v1026_v13 }
  0x2e   :  { %634 = vmatpush.bf16.msrb.mxu3 %v1021_v2 }
  0x2f   :  { %526 = vmatpush.bf16.msrb.mxu0 %v1003_v47 }
  0x30   :  { %539 = vmatpush.bf16.msrb.mxu1 %v1011_v48 }
  0x31   :  { %693 = vmatpush.bf16.msra.mxu2 %v1025_v16 }
  0x32   :  { %635 = vmatpush.bf16.msrb.mxu3 %v1020_v3 }
  0x33   :  { %527 = vmatpush.bf16.msrb.mxu0 %v1002_v49 }
  0x34   :  { %540 = vmatpush.bf16.msrb.mxu1 %v1010_v50 }
  0x35   :  { %694 = vmatpush.bf16.msra.mxu2 %v1024_v18 }
  0x36   :  { %636 = vmatpush.bf16.msrb.mxu3 %v1019_v4 }
  0x37   :  { %528 = vmatpush.bf16.msrb.mxu0 %v1001_v51 }
  0x38   :  { %541 = vmatpush.bf16.msrb.mxu1 %v1009_v52  ;;  %916 = vmatmul.msk.bf16.vlgmr.msrb.gmra.mxu2 %vm468_vm0, %v71_v56 }
  0x39   :  { %695 = vmatpush.bf16.msra.mxu2 %v1023_v36 }
  0x3a   :  { %637 = vmatpush.bf16.msrb.mxu3 %v1018_v5 }
  0x3b   :  { %529 = vmatpush.bf16.msrb.mxu0 %v1000_v54 }
  0x3c   :  { %542 = vmatpush.bf16.msrb.mxu1 %v1008_v55 }
  0x3e   :  { %638 = vmatpush.bf16.msrb.mxu3 %v1017_v6 }
  0x3f   :  { %530 = vmatpush.bf16.msrb.mxu0 %v999_v57 }
  0x40   :  { %543 = vmatpush.bf16.msrb.mxu1 %v1007_v58 }
  0x42   :  { %639 = vmatpush.bf16.msrb.mxu3 %v1016_v7 }
  0x43   :  { %531 = vmatpush.bf16.msrb.mxu0 %v998_v59 }
  0x44   :  { %544 = vmatpush.bf16.msrb.mxu1 %v1006_v60 }
  0x46   :  { %532 = vmatmul.bf16.vlgmr.msrb.gmra.mxu0 %v69_v63  ;;  %640 = vmatpush.bf16.msrb.mxu3 %v1015_v10 }
  0x47   :  { %545 = vmatmul.bf16.vlgmr.msrb.gmra.mxu1 %v70_v0 }
  0xa3   :  { %v481_v8 = vpop.f32.mrf.mxu0 }
  0xa4   :  { %v494_v9 = vpop.f32.mrf.mxu1  ;;  %v482_v19 = vadd.f32 %v1031_v17, %v481_v8 }
  0xa6   :  { %v495_v22 = vadd.f32 %v494_v9, %v482_v19 }
  0xab   :  { %v483_v11 = vpop.f32.mrf.mxu0  ;;  %v507_v14 = vpop.f32.mrf.mxu2 }
  0xac   :  { %v496_v12 = vpop.f32.mrf.mxu1  ;;  %v520_v15 = vpop.f32.mrf.mxu3  ;;  %v508_v23 = vadd.f32 %v507_v14, %v495_v22 }
  0xae   :  { %v521_v25 = vadd.f32 %v520_v15, %v508_v23 }
  0xb3   :  { %v509_v20 = vpop.f32.mrf.mxu2 }
  0xb4   :  { %v522_v21 = vpop.f32.mrf.mxu3 }
  0xbb   :  { %v559_v24 = vpop.f32.mrf.mxu2 }
  0xc3   :  { %v533_v26 = vpop.f32.mrf.mxu0  ;;  %v561_v30 = vpop.f32.mrf.mxu2 }
  0xc4   :  { %v546_v27 = vpop.f32.mrf.mxu1  ;;  %v534_v28 = vadd.f32 %v533_v26, %v521_v25 }
  0xc6   :  { %v547_v29 = vadd.f32 %v546_v27, %v534_v28 }
  0xc8   :  { %v560_v31 = vadd.f32 %v559_v24, %v547_v29 }
  0xca   :  { %v563_v32 = vmax.f32 %v560_v31, 0.0 }
  0xcb   :  { %v535_v33 = vpop.f32.mrf.mxu0 }
  0xcc   :  { %v548_v34 = vpop.f32.mrf.mxu1  ;;  %v564_v35 = vpack.c.bf16 %v563_v32, %v563_v32 }
  0xce   :  { %641 = vmatmul.bf16.vlgmr.msrb.gmra.mxu3 %v564_v35 }
 0x151   :  { %v642_v38 = vpop.f32.mrf.mxu3 }
 0x152   :  { %v643_v39 = vadd.f32 %v1032_v37, %v642_v38 }
 0x154   :  { %v646_v40 = vmax.f32 %v643_v39, 0.0 }
 0x156   :  { %v647_v41 = vpack.c.bf16 %v646_v40, %v646_v40 }
 0x158   :  { %965 = vmatmul.msk.bf16.vlgmr.msra.gmra.mxu2 %vm684_vm1, %v647_v41 }
 0x159   :  { %v644_v42 = vpop.f32.mrf.mxu3 }
 0x1db   :  { %v697_v44 = vpop.f32.mrf.mxu2 }
 0x1dc   :  { %v698_v45 = vadd.f32 %v1033_v43, %v697_v44 }
 0x1de   :  { %702 = vst.msk [vmem:[#allocation5] sm:$0x3] %vm701_vm2, %v698_v45 }
 0x1df   :  { %713 = dma.vmem_to_hbm [thread:$0]  %s709_s14, 32, %s711_s16, [#allocation4]  }
 0x1e3   :  { %v699_v46 = vpop.f32.mrf.mxu2 }
 0x1e4   :  { %1084 = dma.done.wait [#allocation4], 32  }
 0x1e5   :  { %1085 = vsyncadd [#allocation4], 4294967264 }
 0x1e6   :  { %718 = vsyncpa [#allocation3], 1 }
 0x1e7   :  { %719 = vsyncpa [#allocation4], 1 }

</bundles_post_ra>
